<compile_context>
chip_gen: v7x
topology: tpu7x:2x2x1
jax: 0.10.0
libtpu: 0.0.40
codegen_flags: <defaults>
</compile_context>

<pallas_src>
import jax
import jax.numpy as jnp
from jax.experimental import pallas as pl
from jax.experimental.pallas import tpu as pltpu


_SUBLANE_PACK = {4: 8, 2: 16, 1: 32}          # rows per packed vreg for a dtype width


def _round_down(x: int, m: int) -> int:
    return (x // m) * m


def _tpu_vmem_capacity_bytes() -> int:
    try:
        phys = int(pltpu.get_tpu_info().vmem_capacity_bytes)
    except Exception:
        phys = 64 << 20                        # conservative (v7x-sized) fallback
    return max(phys, 32 << 20)


def _default_block_budget_bytes(phys_vmem: int) -> int:
    """Per-input-block budget: 16 MiB on 64 MiB-VMEM parts (v7x), 24 MiB on 128 MiB
    parts (v5e/v6e). Big blocks amortize the ~0.35 us fixed per-grid-step overhead."""
    return int(min(phys_vmem // 4, 24 << 20))


def _tiny_bypass_bytes(phys_vmem: int) -> int:
    """Below a few MiB, pallas_call launch + pipeline prologue (~1-2 us) loses to XLA's
    fused reduce. Crossover is larger on v7x (higher HBM bandwidth)."""
    return (4 << 20) if phys_vmem <= (64 << 20) else (2 << 20)


def _choose_tiles(nc: int, hw: int, itemsize: int, budget: int, want_row_split: bool):
    pack = _SUBLANE_PACK.get(itemsize, 8)
    row_bytes = hw * itemsize

    # (a) Whole array fits in one block.
    if nc * row_bytes <= budget:
        if want_row_split and nc >= 2 * pack:
            # >=2 blocks on the 'parallel' row axis so both v7x TensorCores get work.
            row_tile = max(pack, _round_down(pl.cdiv(nc, 2), pack))
            return row_tile, hw
        return nc, hw

    # (b) Full reduction width in one pass; as many rows per block as the budget allows.
    max_rows = budget // row_bytes
    if max_rows >= pack:
        row_tile = max(pack, min(_round_down(max_rows, pack), _round_down(nc, pack)))
        return row_tile, hw

    # (c) Spatial size too large even for `pack` rows: tile the reduction axis. Keep
    # row_tile minimal (fewer strided DMA segments) and fill the budget with col_tile.
    row_tile = nc if nc <= pack else pack
    col_tile = max(128, _round_down(budget // (row_tile * itemsize), 128))
    if col_tile >= hw:                         # degenerate (tiny forced budget, small hw)
        return row_tile, hw
    return row_tile, col_tile


def _single_pass_kernel(x_ref, o_ref):
    # Full H*W in one block: one cross-lane max per row, written once.
    o_ref[...] = jnp.max(x_ref[...], axis=-1, keepdims=True)


def _make_multipass_kernel(hw: int, col_tile: int, neutral):
    """Column-tiled running max. acc_ref is a lane-dense (row_tile, 128) VMEM scratch;
    boundary masking happens only on the last column block; o_ref is written once."""
    nkb = pl.cdiv(hw, col_tile)                # static number of column blocks
    needs_mask = (hw % col_tile) != 0

    def kernel(x_ref, o_ref, acc_ref):
        k = pl.program_id(1)

        @pl.when(k == 0)
        def _init():
            acc_ref[...] = jnp.full(acc_ref.shape, neutral, dtype=acc_ref.dtype)

        x = x_ref[...]

        if needs_mask:
            @pl.when(k == nkb - 1)
            def _last_block():
                col = (nkb - 1) * col_tile + jax.lax.broadcasted_iota(
                    jnp.int32, x.shape, 1)
                xm = jnp.where(col < hw, x, jnp.asarray(neutral, dtype=x.dtype))
                acc_ref[...] = jnp.maximum(
                    acc_ref[...], jnp.max(xm, axis=-1, keepdims=True))

            @pl.when(k != nkb - 1)
            def _body_block():
                acc_ref[...] = jnp.maximum(
                    acc_ref[...], jnp.max(x, axis=-1, keepdims=True))
        else:
            acc_ref[...] = jnp.maximum(
                acc_ref[...], jnp.max(x, axis=-1, keepdims=True))

        @pl.when(k == nkb - 1)
        def _write():
            o_ref[...] = acc_ref[:, 0:1]

    return kernel


def global_max_pool(x: jax.Array, *, force_pallas: bool = False,
                    block_budget_bytes: int | None = None) -> jax.Array:
    """Equivalent of nn.functional.adaptive_max_pool2d(x, 1).reshape(1, -1).

    x: (N, C, H, W) array. Returns (1, N*C) array of the same dtype.
    Float and (un)signed integer dtypes take the Pallas path; bool/complex (no clean
    max-neutral element) always use the XLA fallback.
    """
    n, c, h, w = x.shape
    nc, hw = n * c, h * w
    dtype = jnp.dtype(x.dtype)
    itemsize = dtype.itemsize

    phys = _tpu_vmem_capacity_bytes()
    supported = jnp.issubdtype(dtype, jnp.floating) or jnp.issubdtype(dtype, jnp.integer)
    total_bytes = nc * hw * itemsize

    # Tiny inputs (or unsupported dtypes): fused-XLA reduce wins / required.
    if (not supported) or (not force_pallas and total_bytes < _tiny_bypass_bytes(phys)):
        return jnp.max(x, axis=(2, 3)).reshape(1, -1)

    budget = int(block_budget_bytes) if block_budget_bytes else _default_block_budget_bytes(phys)
    want_row_split = phys <= (64 << 20)        # 64 MiB VMEM => v7x-class, 2 TensorCores
    row_tile, col_tile = _choose_tiles(nc, hw, itemsize, budget, want_row_split)
    grid = (pl.cdiv(nc, row_tile), pl.cdiv(hw, col_tile))

    if jnp.issubdtype(dtype, jnp.floating):
        neutral = -jnp.inf
    else:
        neutral = int(jnp.iinfo(dtype).min)    # 0 for unsigned ints (correct neutral)

    multipass = grid[1] > 1
    if multipass:
        kernel = _make_multipass_kernel(hw, col_tile, neutral)
        scratch = [pltpu.VMEM((row_tile, 128), dtype)]
    else:
        kernel = _single_pass_kernel
        scratch = []

    pack = _SUBLANE_PACK.get(itemsize, 8)
    pad_rows = pl.cdiv(row_tile, pack) * pack
    pad_cols = pl.cdiv(col_tile, 128) * 128
    in_block_bytes = pad_rows * pad_cols * itemsize
    acc_bytes = pad_rows * 128 * itemsize if multipass else 0
    # 2x double-buffered input + scratch + headroom; generation-aware clamp.
    vmem_limit = int(2.75 * in_block_bytes) + 2 * acc_bytes + (2 << 20)
    vmem_limit = max(vmem_limit, 16 << 20)
    vmem_limit = min(vmem_limit, phys - (4 << 20))

    x2d = x.reshape(nc, hw)
    out = pl.pallas_call(
        kernel,
        out_shape=jax.ShapeDtypeStruct((nc, 1), x.dtype),
        grid_spec=pltpu.PrefetchScalarGridSpec(
            num_scalar_prefetch=0,
            grid=grid,
            in_specs=[pl.BlockSpec((row_tile, col_tile), lambda i, k: (i, k))],
            out_specs=pl.BlockSpec((row_tile, 1), lambda i, k: (i, 0)),
            scratch_shapes=scratch,
        ),
        compiler_params=pltpu.CompilerParams(
            dimension_semantics=("parallel", "arbitrary"),
            vmem_limit_bytes=int(vmem_limit),
        ),
        cost_estimate=pl.CostEstimate(          # advisory only
            flops=nc * hw,
            transcendentals=0,
            bytes_accessed=nc * hw * itemsize + nc * itemsize,
        ),
    )(x2d)

    return out.reshape(1, -1)


if __name__ == "__main__":
    key = jax.random.PRNGKey(0)

    # Required small NCHW input consistent with the module's forward.
    x = jax.random.normal(key, (2, 4, 16, 16), dtype=jnp.float32)
    ref = jnp.max(x, axis=(2, 3)).reshape(1, -1)

    # 1) Force the Pallas path so the kernel actually runs at the spec shape.
    y = jax.block_until_ready(global_max_pool(x, force_pallas=True))
    assert y.shape == (1, 2 * 4), y.shape
    assert bool(jnp.allclose(y, ref)), "mismatch vs reference (pallas, small)"

    # 2) Default dispatch: tiny input takes the fused-XLA fast path.
    y2 = jax.block_until_ready(global_max_pool(x))
    assert bool(jnp.allclose(y2, ref)), "mismatch vs reference (bypass)"

    # 3) Non-128-multiple spatial size, full-width single-pass block.
    x7 = jax.random.normal(jax.random.PRNGKey(1), (2, 4, 7, 7), dtype=jnp.float32)
    y7 = jax.block_until_ready(global_max_pool(x7, force_pallas=True))
    assert bool(jnp.allclose(y7, jnp.max(x7, axis=(2, 3)).reshape(1, -1))), "mismatch (7x7)"

    # 4) Forced reduction-axis tiling with last-block -inf masking (hw % col_tile != 0).
    x23 = jax.random.normal(jax.random.PRNGKey(2), (2, 4, 23, 23), dtype=jnp.float32)
    y23 = jax.block_until_ready(
        global_max_pool(x23, force_pallas=True, block_budget_bytes=8 * 1024))
    assert bool(jnp.allclose(y23, jnp.max(x23, axis=(2, 3)).reshape(1, -1))), "mismatch (tiled hw)"

    # 5) Forced reduction-axis tiling, exact multiple (no-mask multipass branch).
    x32 = jax.random.normal(jax.random.PRNGKey(5), (1, 8, 32, 32), dtype=jnp.float32)
    y32 = jax.block_until_ready(
        global_max_pool(x32, force_pallas=True, block_budget_bytes=16 * 1024))
    assert bool(jnp.allclose(y32, jnp.max(x32, axis=(2, 3)).reshape(1, -1))), "mismatch (tiled, exact)"

    # 6) bf16 with row tiling (sublane pack of 16) via a small forced budget.
    xb = jax.random.normal(jax.random.PRNGKey(3), (2, 64, 32, 32), dtype=jnp.bfloat16)
    yb = jax.block_until_ready(
        global_max_pool(xb, force_pallas=True, block_budget_bytes=64 * 1024))
    assert bool(jnp.array_equal(yb, jnp.max(xb, axis=(2, 3)).reshape(1, -1))), "mismatch (bf16)"

    # 7) Medium input, default dispatch (Pallas single-pass; row split on v7x-class HW).
    xm = jax.random.normal(jax.random.PRNGKey(4), (2, 64, 128, 128), dtype=jnp.float32)
    ym = jax.block_until_ready(global_max_pool(xm))
    assert bool(jnp.allclose(ym, jnp.max(xm, axis=(2, 3)).reshape(1, -1))), "mismatch (medium)"

    # 8) Large input, default budget: big full-width blocks + raised vmem_limit path.
    xl = jax.random.normal(jax.random.PRNGKey(6), (2, 64, 256, 256), dtype=jnp.float32)
    yl = jax.block_until_ready(global_max_pool(xl))
    assert bool(jnp.allclose(yl, jnp.max(xl, axis=(2, 3)).reshape(1, -1))), "mismatch (large)"

    print("KERNEL_OK")
</pallas_src>

<mosaic_0001>
module attributes {stable_mosaic.version = 11 : i64} {
  func.func @_single_pass_kernel(%arg0: i32, %arg1: i32, %arg2: memref<8x256xf32, #tpu.memory_space<vmem>>, %arg3: memref<8x1xf32, #tpu.memory_space<vmem>>) attributes {dimension_semantics = [#tpu.dimension_semantics<parallel>, #tpu.dimension_semantics<arbitrary>], iteration_bounds = array<i64: 1, 1>, scalar_prefetch = 0 : i64, scratch_operands = 0 : i64, tpu.core_type = #tpu.core_type<tc>, window_params = [{transform_indices = @transform_0, window_bounds = array<i64: 8, 256>}, {transform_indices = @transform_1, window_bounds = array<i64: 8, 1>}]} {
    %c0 = arith.constant 0 : index
    %c0_0 = arith.constant 0 : index
    %0 = vector.load %arg2[%c0, %c0_0] : memref<8x256xf32, #tpu.memory_space<vmem>>, vector<8x256xf32>
    %cst = arith.constant dense<0xFF800000> : vector<8xf32>
    %1 = vector.multi_reduction <maximumf>, %0, %cst [1] : vector<8x256xf32> to vector<8xf32>
    %2 = vector.shape_cast %1 : vector<8xf32> to vector<8x1xf32>
    %c0_1 = arith.constant 0 : index
    %c0_2 = arith.constant 0 : index
    %3 = vector.load %arg3[%c0_1, %c0_2] : memref<8x1xf32, #tpu.memory_space<vmem>>, vector<8x1xf32>
    tpu.vector_store %arg3[%c0_1, %c0_2], %2 {strides = array<i32>} : memref<8x1xf32, #tpu.memory_space<vmem>>, vector<8x1xf32>,
    return
  }
  func.func @transform_0(%arg0: i32, %arg1: i32) -> (i32, i32) {
    %c0_i32 = arith.constant 0 : i32
    return %arg0, %arg1 : i32, i32
  }
  func.func @transform_1(%arg0: i32, %arg1: i32) -> (i32, i32) {
    %c0_i32 = arith.constant 0 : i32
    %c0_i32_0 = arith.constant 0 : i32
    return %arg0, %c0_i32 : i32, i32
  }
}

</mosaic_0001>

<bundles_post_ra>
// kernel: tpu_custom_call.1
= control target key start
LH: loop header
LB: loop body
LE: loop exit
PB: predicated region body
PF: predicated region fallthrough
CT: control target
= control target key end

     0   :  { %6 = vsyncpa [#allocation3], 0  ;;  %s57_s6 = smov [#allocation2]   ;;  %s83_s0 = inlined_call_operand.hbm [shape: f32[8,256], index: 0, kind: input, shape index: {}]   ;;  %s84_s1 = inlined_call_operand.vmem [shape: f32[8,1], index: 1, kind: output, shape index: {}]  }
   0x1   :  { %s13_s7 = sshll.u32 %s57_s6, 4  ;;  %s33_s10 = scalar_lea.hbm %s83_s0, 256  ;;  %s14_s7 = int_to_ptr.vmem [resolvable:$true] %s13_s7 }
   0x2   :  { %p34_p0 = scmp.ne.s32.totalorder %s83_s0, %s33_s10  ;;  %p37_p1 = scmp.lt.u32.totalorder %s33_s10, %s83_s0 }
   0x4   :  { %p39_p2 = pnand %p37_p1, %p34_p0 }
   0x6   :  { %42 = shalt.err (!%p39_p2)
}
   0x7   :  { %s43_s15 = scalar_lea.vmem %s14_s7, 256  ;;  %p48_p4 = scmp.lt.s32.totalorder %s14_s7, %s14_s7 }
   0x8   :  { %p44_p3 = scmp.ne.s32.totalorder %s14_s7, %s43_s15  ;;  %p49_p5 = scmp.lt.s32.totalorder %s43_s15, %s43_s15 }
   0xa   :  { %p50_p6 = por %p49_p5, %p48_p4 }
   0xc   :  { %p51_p7 = pnand %p50_p6, %p44_p3 }
   0xe   :  { %54 = shalt.err (!%p51_p7)
}
   0xf   :  { %16 = dma.hbm_to_vmem [thread:$0]  %s83_s0, 256, %s14_s7, [#allocation3]  }
  0x10   :  { %55 = dma.done.wait [#allocation3], 256  }
  0x11   :  { %56 = vsyncadd [#allocation3], 4294967040  ;;  %v20_v0 = vld [vmem:[#allocation2] sm:$0xff]  ;;  %v21_v1 = vld [vmem:[#allocation2 + $0x8] sm:$0xff]  ;;  %vm25_vm0 = vcmask 7168  }
  0x12   :  { %v22_v2 = vmax.f32 %v20_v0, %v21_v1 }
  0x14   :  { %23 = vmax.xlane.f32.xlu0 %v22_v2 }
  0xa1   :  { %v24_v3 = vpop.xlane.xlu0 %23 }
  0xa2   :  { %26 = vst.msk [vmem:[%s84_s1] sm:$0xff] %vm25_vm0, %v24_v3 }
  0xa3   :  { %31 = vsyncpa [#allocation3], 1 }

</bundles_post_ra>
